<compile_context>
chip_gen: v7x
topology: tpu7x:2x2x1
jax: 0.10.0
libtpu: 0.0.40
codegen_flags: <defaults>
</compile_context>

<pallas_src>
import jax
import jax.numpy as jnp
from jax.experimental import pallas as pl
from jax.experimental.pallas import tpu as pltpu


def _relu_kernel(x_ref, o_ref):
    # Elementwise ReLU on the current VMEM tile (pure VPU work).
    o_ref[...] = jnp.maximum(x_ref[...], jnp.zeros((), x_ref.dtype))


def _cdiv(a: int, b: int) -> int:
    return -(-a // b)


def relu_pallas(x: jax.Array) -> jax.Array:
    """ReLU(x) = max(x, 0); same shape/dtype as input."""
    orig_shape = x.shape
    dtype = x.dtype
    n = int(x.size)
    if n == 0:
        return x

    itemsize = jnp.dtype(dtype).itemsize

    # Lane-dense slab width (multiple of 128 lanes).
    if itemsize >= 4:
        cols = 1024
    elif itemsize == 2:
        cols = 2048
    else:
        cols = 4096

    # Packed sublane count: 8 for 32-bit, 16 for 16-bit, 32 for 8-bit dtypes.
    sublane = max(8, 32 // itemsize)

    # ~2 MiB per block: 2 buffers x (in + out) x 2 MiB = 8 MiB of scoped VMEM,
    # safe on every generation, and already at ~85% of HBM roofline.
    block_bytes = 2 * 1024 * 1024
    tile_rows = (block_bytes // (cols * itemsize)) // sublane * sublane
    tile_rows = max(sublane, tile_rows)

    # Rows needed to hold all elements at this lane width.
    rows_needed = _cdiv(n, cols)
    # Never exceed the data by more than one sublane-aligned tile.
    tile_rows = min(tile_rows, _cdiv(rows_needed, sublane) * sublane)

    # Always tile: pad the flattened slab to a whole number of row tiles.
    num_blocks = _cdiv(rows_needed, tile_rows)
    rows = num_blocks * tile_rows
    padded_n = rows * cols

    flat = x.reshape(-1)
    if padded_n != n:
        flat = jnp.pad(flat, (0, padded_n - n))
    x2 = flat.reshape(rows, cols)

    out = pl.pallas_call(
        _relu_kernel,
        out_shape=jax.ShapeDtypeStruct((rows, cols), dtype),
        grid=(num_blocks,),
        in_specs=[pl.BlockSpec((tile_rows, cols), lambda i: (i, 0))],
        out_specs=pl.BlockSpec((tile_rows, cols), lambda i: (i, 0)),
        compiler_params=pltpu.CompilerParams(
            dimension_semantics=("parallel",),
        ),
    )(x2)

    out_flat = out.reshape(-1)
    if padded_n != n:
        out_flat = out_flat[:n]
    return out_flat.reshape(orig_shape)


if __name__ == "__main__":
    key = jax.random.PRNGKey(0)

    # Small NCHW input consistent with a typical conv-net activation.
    x = jax.random.normal(key, (2, 4, 16, 16), dtype=jnp.float32)
    y = relu_pallas(x)
    jax.block_until_ready(y)
    y_ref = jnp.maximum(x, 0.0)
    assert y.shape == x.shape and y.dtype == x.dtype
    assert jnp.allclose(y, y_ref), "ReLU kernel mismatch (f32 NCHW)"

    # Odd (non-divisible) shape to exercise the padding path.
    x2 = jax.random.normal(jax.random.PRNGKey(1), (3, 7, 5), dtype=jnp.bfloat16)
    y2 = relu_pallas(x2)
    jax.block_until_ready(y2)
    y2_ref = jnp.maximum(x2, jnp.zeros((), x2.dtype))
    assert y2.shape == x2.shape and y2.dtype == x2.dtype
    assert jnp.array_equal(y2, y2_ref), "ReLU kernel mismatch (bf16 ragged)"

    print("KERNEL_OK")
</pallas_src>

<mosaic_0001>
module attributes {stable_mosaic.version = 11 : i64} {
  func.func @_relu_kernel(%arg0: i32, %arg1: memref<8x1024xf32, #tpu.memory_space<vmem>>, %arg2: memref<8x1024xf32, #tpu.memory_space<vmem>>) attributes {dimension_semantics = [#tpu.dimension_semantics<parallel>], iteration_bounds = array<i64: 1>, scalar_prefetch = 0 : i64, scratch_operands = 0 : i64, tpu.core_type = #tpu.core_type<tc>, window_params = [{transform_indices = @transform_0, window_bounds = array<i64: 8, 1024>}, {transform_indices = @transform_1, window_bounds = array<i64: 8, 1024>}]} {
    %c0 = arith.constant 0 : index
    %c0_0 = arith.constant 0 : index
    %0 = vector.load %arg1[%c0, %c0_0] : memref<8x1024xf32, #tpu.memory_space<vmem>>, vector<8x1024xf32>
    %cst = arith.constant 0.000000e+00 : f32
    %1 = vector.broadcast %cst : f32 to vector<8x1024xf32>
    %2 = arith.maximumf %0, %1 : vector<8x1024xf32>
    %c0_1 = arith.constant 0 : index
    %c0_2 = arith.constant 0 : index
    %3 = vector.load %arg2[%c0_1, %c0_2] : memref<8x1024xf32, #tpu.memory_space<vmem>>, vector<8x1024xf32>
    tpu.vector_store %arg2[%c0_1, %c0_2], %2 {strides = array<i32>} : memref<8x1024xf32, #tpu.memory_space<vmem>>, vector<8x1024xf32>,
    return
  }
  func.func @transform_0(%arg0: i32) -> (i32, i32) {
    %c0_i32 = arith.constant 0 : i32
    %c0_i32_0 = arith.constant 0 : i32
    return %arg0, %c0_i32 : i32, i32
  }
  func.func @transform_1(%arg0: i32) -> (i32, i32) {
    %c0_i32 = arith.constant 0 : i32
    %c0_i32_0 = arith.constant 0 : i32
    return %arg0, %c0_i32 : i32, i32
  }
}

</mosaic_0001>

<bundles_post_ra>
// kernel: tpu_custom_call.1
= control target key start
LH: loop header
LB: loop body
LE: loop exit
PB: predicated region body
PF: predicated region fallthrough
CT: control target
= control target key end

     0   :  { %6 = vsyncpa [#allocation3], 0  ;;  %s146_s0 = inlined_call_operand.hbm [shape: f32[8,1024], index: 0, kind: input, shape index: {}]   ;;  %s147_s1 = inlined_call_operand.hbm [shape: f32[8,1024], index: 1, kind: output, shape index: {}]  }
   0x1   :  { %7 = vsyncpa [#allocation4], 0  ;;  %s110_s6 = smov [#allocation2]   ;;  %s62_s10 = scalar_lea.hbm %s146_s0, 1024 }
   0x2   :  { %s14_s7 = sshll.u32 %s110_s6, 4  ;;  %p63_p0 = scmp.ne.s32.totalorder %s146_s0, %s62_s10  ;;  %s15_s7 = int_to_ptr.vmem [resolvable:$true] %s14_s7 }
   0x3   :  { %p66_p1 = scmp.lt.u32.totalorder %s62_s10, %s146_s0 }
   0x5   :  { %p68_p2 = pnand %p66_p1, %p63_p0 }
   0x7   :  { %71 = shalt.err (!%p68_p2)
}
   0x8   :  { %s72_s15 = scalar_lea.vmem %s15_s7, 1024  ;;  %p77_p4 = scmp.lt.s32.totalorder %s15_s7, %s15_s7 }
   0x9   :  { %p73_p3 = scmp.ne.s32.totalorder %s15_s7, %s72_s15  ;;  %p78_p5 = scmp.lt.s32.totalorder %s72_s15, %s72_s15 }
   0xb   :  { %p79_p6 = por %p78_p5, %p77_p4 }
   0xd   :  { %p80_p7 = pnand %p79_p6, %p73_p3 }
   0xf   :  { %83 = shalt.err (!%p80_p7)
}
  0x10   :  { %17 = dma.hbm_to_vmem [thread:$0]  %s146_s0, 1024, %s15_s7, [#allocation3]  }
  0x11   :  { %106 = dma.done.wait [#allocation3], 1024  }
  0x12   :  { %107 = vsyncadd [#allocation3], 4294966272  ;;  %v21_v0 = vld [vmem:[#allocation2] sm:$0xff]  ;;  %v22_v1 = vld [vmem:[#allocation2 + $0x8] sm:$0xff]  ;;  %s111_s18 = smov [#allocation5]  }
  0x13   :  { %v23_v2 = vld [vmem:[#allocation2 + $0x10] sm:$0xff]  ;;  %s51_s19 = sshll.u32 %s111_s18, 4  ;;  %v29_v3 = vmax.f32 %v21_v0, 0.0  ;;  %v30_v4 = vmax.f32 %v22_v1, 0.0  ;;  %v24_v6 = vld [vmem:[#allocation2 + $0x18] sm:$0xff]  ;;  %v25_v7 = vld [vmem:[#allocation2 + $0x20] sm:$0xff]  ;;  %s52_s19 = int_to_ptr.vmem [resolvable:$true] %s51_s19 }
  0x14   :  { %v31_v5 = vmax.f32 %v23_v2, 0.0  ;;  %v26_v8 = vld [vmem:[#allocation2 + $0x28] sm:$0xff]  ;;  %v32_v9 = vmax.f32 %v24_v6, 0.0  ;;  %v33_v10 = vmax.f32 %v25_v7, 0.0  ;;  %v27_v12 = vld [vmem:[#allocation2 + $0x30] sm:$0xff]  ;;  %v28_v13 = vld [vmem:[#allocation2 + $0x38] sm:$0xff]  ;;  %p89_p9 = scmp.lt.s32.totalorder %s52_s19, %s52_s19 }
  0x15   :  { %v34_v11 = vmax.f32 %v26_v8, 0.0  ;;  %37 = vst [vmem:[#allocation5] sm:$0xff] %v29_v3  ;;  %38 = vst [vmem:[#allocation5 + $0x8] sm:$0xff] %v30_v4  ;;  %v35_v14 = vmax.f32 %v27_v12, 0.0  ;;  %v36_v15 = vmax.f32 %v28_v13, 0.0  ;;  %s84_s0 = scalar_lea.vmem %s52_s19, 1024 }
  0x16   :  { %39 = vst [vmem:[#allocation5 + $0x10] sm:$0xff] %v31_v5  ;;  %40 = vst [vmem:[#allocation5 + $0x18] sm:$0xff] %v32_v9  ;;  %p85_p8 = scmp.ne.s32.totalorder %s52_s19, %s84_s0  ;;  %p90_p10 = scmp.lt.s32.totalorder %s84_s0, %s84_s0 }
  0x17   :  { %41 = vst [vmem:[#allocation5 + $0x20] sm:$0xff] %v33_v10  ;;  %42 = vst [vmem:[#allocation5 + $0x28] sm:$0xff] %v34_v11 }
  0x18   :  { %43 = vst [vmem:[#allocation5 + $0x30] sm:$0xff] %v35_v14  ;;  %44 = vst [vmem:[#allocation5 + $0x38] sm:$0xff] %v36_v15  ;;  %p91_p11 = por %p90_p10, %p89_p9 }
  0x1a   :  { %p92_p12 = pnand %p91_p11, %p85_p8 }
  0x1c   :  { %95 = shalt.err (!%p92_p12)
}
  0x1d   :  { %s96_s22 = scalar_lea.hbm %s147_s1, 1024 }
  0x1e   :  { %p97_p13 = scmp.ne.s32.totalorder %s147_s1, %s96_s22  ;;  %p100_p0 = scmp.lt.u32.totalorder %s96_s22, %s147_s1 }
  0x20   :  { %p102_p1 = pnand %p100_p0, %p97_p13 }
  0x22   :  { %105 = shalt.err (!%p102_p1)
}
  0x23   :  { %54 = dma.vmem_to_hbm [thread:$0]  %s52_s19, 1024, %s147_s1, [#allocation4]  }
  0x24   :  { %108 = dma.done.wait [#allocation4], 1024  }
  0x25   :  { %109 = vsyncadd [#allocation4], 4294966272 }
  0x26   :  { %58 = vsyncpa [#allocation3], 1 }
  0x27   :  { %59 = vsyncpa [#allocation4], 1 }

</bundles_post_ra>
